<compile_context>
chip_gen: v7x
topology: tpu7x:2x2x1
jax: 0.10.0
libtpu: 0.0.40
codegen_flags: <defaults>
</compile_context>

<pallas_src>
import math

import numpy as np
import jax
import jax.numpy as jnp
from jax.experimental import pallas as pl
from jax.experimental.pallas import tpu as pltpu


# -----------------------------------------------------------------------------
# Per-generation VMEM sizing
# -----------------------------------------------------------------------------
def _vmem_capacity_bytes():
    try:
        info = pltpu.get_tpu_info()
        cap = getattr(info, "vmem_capacity_bytes", None)
        if cap:
            return int(cap)
    except Exception:
        pass
    return 64 * 1024 * 1024                      # conservative fallback (v7x-sized)


_VMEM_CAP = _vmem_capacity_bytes()
# Resident-bytes budget used by the tiling heuristics (counts double-buffered
# blocks + scratch + slack) and the scoped-VMEM limit handed to Mosaic.
_VMEM_BUDGET = min(_VMEM_CAP // 2, 64 * 1024 * 1024)
_VMEM_LIMIT = min(int(_VMEM_CAP * 0.75), 96 * 1024 * 1024)
_SLACK = 2 * 1024 * 1024
_COUT_TILE = 256                                 # Cout chunk width for deep layers


# -----------------------------------------------------------------------------
# Tiling helpers
# -----------------------------------------------------------------------------
def _pad_lane(c):
    return ((c + 127) // 128) * 128


def _pad_sub(c):
    return ((c + 7) // 8) * 8


def _row_tile(H, max_rows, min_tiles=1):
    """Largest divisor of H that is a multiple of 8 (or H itself), <= max_rows,
    preferring at least `min_tiles` grid steps (megacore balance when N==1)."""
    def cands(mt):
        return [d for d in range(1, H + 1)
                if H % d == 0 and (d % 8 == 0 or d == H) and H // d >= mt]
    cs = cands(min_tiles) or cands(1)
    under = [d for d in cs if d <= max_rows]
    return max(under) if under else min(cs)


def _conv_rows_for_vmem(Wc, Cin, Cout, pool, budget):
    ci, co = _pad_lane(Cin), _pad_lane(Cout)
    k9 = _pad_lane(9 * Cin)
    fh = 2 if pool else 1
    tc = min(Cout, _COUT_TILE)
    per_row = (fh * fh * Wc * ci * 2 * 2        # input tile (bf16, double-buffered)
               + Wc * co * 2 * 2                # output tile (bf16, double-buffered)
               + (Wc + 2) * ci * 4              # xpad scratch (f32)
               + Wc * k9 * 2                    # im2col slab (bf16)
               + Wc * tc * 4 * 2)               # live f32 accumulator chunk
    fixed = (9 * Cin * co * 2 * 2               # weights (bf16, double-buffered)
             + 2 * fh * fh * Wc * ci * 2 * 2    # two halo blocks (double-buffered)
             + 2 * (Wc + 2) * ci * 4            # xpad halo rows
             + _SLACK)
    return max(1, (budget - fixed) // per_row)


def _pointwise_rows_for_vmem(W, K, Cout, budget):
    kp, co = _pad_lane(K), _pad_lane(Cout)
    per_row = (W * kp * 2 * 2 + W * co * 2 * 2 + W * kp * 2 + W * co * 4 * 2)
    fixed = K * co * 2 * 2 + _SLACK
    return max(1, (budget - fixed) // per_row)


def _score_rows_for_vmem(w, C, budget):
    cp = _pad_lane(C)
    per_row = w * cp * 2 * 2 + w * cp * 4 + _pad_lane(w) * 4 * 2
    return max(1, (budget - _SLACK) // per_row)


def _combine_rows_for_vmem(W, C1, side_dims, budget):
    c1 = _pad_lane(C1)
    fixed = _SLACK
    per_row = (W * c1 * 2 * 2                   # v1 tile (bf16, double-buffered)
               + _pad_lane(W) * 4 * 2           # output tile (f32, double-buffered)
               + _pad_lane(W) * 4 * 4)          # f32 accumulator / temps
    for (h_i, w_i) in side_dims:
        fixed += 2 * _pad_sub(h_i) * _pad_lane(w_i) * 4    # s_i block
        fixed += 2 * _pad_sub(w_i) * _pad_lane(W) * 4      # lx_i block
        per_row += 2 * _pad_lane(h_i) * 4                  # ly_i rows
        per_row += _pad_lane(w_i) * 4                      # t temp
    return max(1, (budget - fixed) // per_row)


# -----------------------------------------------------------------------------
# Fused (maxpool) / 3x3 conv (im2col, K = 9*Cin) / bias / ReLU kernel
# -----------------------------------------------------------------------------
def conv3x3(x, w, b, *, pool=False, max_rows=1024):
    """Fused [2x2 maxpool] -> 3x3 conv (pad 1) -> bias -> ReLU.

    x: (N, Hin, Win, Cin) NHWC bf16.  Output: (N, Hc, Wc, Cout) bfloat16 with
    (Hc, Wc) = (Hin, Win) or (Hin/2, Win/2) when pool=True.
    """
    N, Hin, Win, Cin = x.shape
    Cout = w.shape[-1]
    fh = 2 if pool else 1
    Hc, Wc = Hin // fh, Win // fh

    rows_budget = _conv_rows_for_vmem(Wc, Cin, Cout, pool, _VMEM_BUDGET)
    TH = _row_tile(Hc, min(max_rows, rows_budget),
                   min_tiles=2 if N == 1 else 1)
    nR = Hc // TH

    wk = w.reshape(9 * Cin, Cout).astype(jnp.bfloat16)   # K-folded bf16 weights
    b2 = b.reshape(1, Cout).astype(jnp.float32)

    # Group the 9 taps so every slab store starts at a 128-lane-aligned offset
    # (pairs of taps for Cin=64, single taps when Cin % 128 == 0).
    groups, cur, width = [], [], 0
    for t in range(9):
        cur.append(t)
        width += Cin
        if width % 128 == 0:
            groups.append(cur)
            cur, width = [], 0
    if cur:
        groups.append(cur)

    cout_chunks = [(c0, min(c0 + _COUT_TILE, Cout))
                   for c0 in range(0, Cout, _COUT_TILE)]

    def kernel(cur_ref, top_ref, bot_ref, w_ref, b_ref, o_ref, xpad, slab):
        r = pl.program_id(1)
        n_r = pl.num_programs(1)

        def prep(v):                       # raw input rows -> conv-input rows (f32)
            v = v.astype(jnp.float32)
            if pool:
                v = jnp.maximum(v[0::2], v[1::2])
                v = jnp.maximum(v[:, 0::2], v[:, 1::2])
            return v

        zero_row = jnp.zeros((1, Wc + 2, Cin), jnp.float32)
        zero_col = jnp.zeros((TH + 2, 1, Cin), jnp.float32)

        # Left/right zero-padding columns (also covers the 4 corners).
        xpad[:, 0:1, :] = zero_col
        xpad[:, Wc + 1:Wc + 2, :] = zero_col
        # Interior rows of this tile.
        xpad[1:TH + 1, 1:Wc + 1, :] = prep(cur_ref[0])

        # Top halo row: previous tile's last row, or zero padding at the edge.
        @pl.when(r > 0)
        def _():
            xpad[0:1, 1:Wc + 1, :] = prep(top_ref[0])

        @pl.when(r == 0)
        def _():
            xpad[0:1, :, :] = zero_row

        # Bottom halo row.
        @pl.when(r < n_r - 1)
        def _():
            xpad[TH + 1:TH + 2, 1:Wc + 1, :] = prep(bot_ref[0])

        @pl.when(r == n_r - 1)
        def _():
            xpad[TH + 1:TH + 2, :, :] = zero_row

        # im2col: copy the 9 shifted windows into one (TH, Wc, 9*Cin) bf16 slab.
        off = 0
        for g in groups:
            parts = []
            for t in g:
                dy, dx = t // 3, t % 3
                parts.append(xpad[dy:dy + TH, dx:dx + Wc, :].astype(jnp.bfloat16))
            val = parts[0] if len(parts) == 1 else jnp.concatenate(parts, axis=-1)
            slab[:, :, off:off + len(g) * Cin] = val
            off += len(g) * Cin

        # One K=9*Cin bf16 MXU matmul per 256-wide Cout chunk, f32 accumulation.
        patch = slab[...].reshape(TH * Wc, 9 * Cin)
        for (c0, c1) in cout_chunks:
            acc = jnp.dot(patch, w_ref[:, c0:c1],
                          preferred_element_type=jnp.float32)
            acc = jnp.maximum(acc + b_ref[:, c0:c1], 0.0)       # f32 epilogue
            o_ref[0, :, :, c0:c1] = acc.reshape(TH, Wc, c1 - c0).astype(o_ref.dtype)

    if pool:
        cur_spec = pl.BlockSpec((1, 2 * TH, 2 * Wc, Cin), lambda n, r: (n, r, 0, 0))
        halo_blk = (1, 2, 2 * Wc, Cin)     # 2 pre-pool rows -> 1 pooled halo row
    else:
        cur_spec = pl.BlockSpec((1, TH, Wc, Cin), lambda n, r: (n, r, 0, 0))
        halo_blk = (1, 1, Wc, Cin)

    top_spec = pl.BlockSpec(
        halo_blk, lambda n, r: (n, jnp.maximum(r * TH - 1, 0), 0, 0))
    bot_spec = pl.BlockSpec(
        halo_blk, lambda n, r: (n, jnp.minimum(r * TH + TH, Hc - 1), 0, 0))

    return pl.pallas_call(
        kernel,
        out_shape=jax.ShapeDtypeStruct((N, Hc, Wc, Cout), jnp.bfloat16),
        grid=(N, nR),
        in_specs=[cur_spec, top_spec, bot_spec,
                  pl.BlockSpec((9 * Cin, Cout), lambda n, r: (0, 0)),
                  pl.BlockSpec((1, Cout), lambda n, r: (0, 0))],
        out_specs=pl.BlockSpec((1, TH, Wc, Cout), lambda n, r: (n, r, 0, 0)),
        scratch_shapes=[pltpu.VMEM((TH + 2, Wc + 2, Cin), jnp.float32),
                        pltpu.VMEM((TH, Wc, 9 * Cin), jnp.bfloat16)],
        compiler_params=pltpu.CompilerParams(
            dimension_semantics=("parallel", "parallel"),
            vmem_limit_bytes=_VMEM_LIMIT),
    )(x, x, x, wk, b2)


# -----------------------------------------------------------------------------
# Pointwise conv (matmul over the minor dim) + bias + ReLU -> bf16
# Used for the Cin=3 first layer after the XLA-side K=27 im2col repack.
# -----------------------------------------------------------------------------
def pointwise_conv_relu(x, w, b, *, max_rows=1024):
    N, H, W, K = x.shape
    Cout = w.shape[-1]
    rows_budget = _pointwise_rows_for_vmem(W, K, Cout, _VMEM_BUDGET)
    TH = _row_tile(H, min(max_rows, rows_budget),
                   min_tiles=2 if N == 1 else 1)
    wk = w.reshape(K, Cout).astype(jnp.bfloat16)
    b2 = b.reshape(1, Cout).astype(jnp.float32)

    def kernel(x_ref, w_ref, b_ref, o_ref):
        v = x_ref[0].astype(jnp.bfloat16).reshape(TH * W, K)
        acc = jnp.dot(v, w_ref[...], preferred_element_type=jnp.float32)
        acc = jnp.maximum(acc + b_ref[...], 0.0)
        o_ref[0] = acc.reshape(TH, W, Cout).astype(o_ref.dtype)

    return pl.pallas_call(
        kernel,
        out_shape=jax.ShapeDtypeStruct((N, H, W, Cout), jnp.bfloat16),
        grid=(N, H // TH),
        in_specs=[pl.BlockSpec((1, TH, W, K), lambda n, r: (n, r, 0, 0)),
                  pl.BlockSpec((K, Cout), lambda n, r: (0, 0)),
                  pl.BlockSpec((1, Cout), lambda n, r: (0, 0))],
        out_specs=pl.BlockSpec((1, TH, W, Cout), lambda n, r: (n, r, 0, 0)),
        compiler_params=pltpu.CompilerParams(
            dimension_semantics=("parallel", "parallel"),
            vmem_limit_bytes=_VMEM_LIMIT),
    )(x, wk, b2)


# -----------------------------------------------------------------------------
# Per-side 1x1 score conv (combine weight pre-folded) at the SOURCE resolution.
# Produces tiny low-res (N, h, w) f32 maps -- no full-resolution intermediates.
# -----------------------------------------------------------------------------
def score_map(v, wf, *, max_rows=1024):
    N, h, w, C = v.shape
    rows_budget = _score_rows_for_vmem(w, C, _VMEM_BUDGET)
    TH = _row_tile(h, min(max_rows, rows_budget),
                   min_tiles=2 if N == 1 else 1)
    wf3 = wf.reshape(1, 1, C).astype(jnp.float32)

    def kernel(v_ref, w_ref, o_ref):
        o_ref[0] = jnp.sum(v_ref[0].astype(jnp.float32) * w_ref[...], axis=-1)

    return pl.pallas_call(
        kernel,
        out_shape=jax.ShapeDtypeStruct((N, h, w), jnp.float32),
        grid=(N, h // TH),
        in_specs=[pl.BlockSpec((1, TH, w, C), lambda n, r: (n, r, 0, 0)),
                  pl.BlockSpec((1, 1, C), lambda n, r: (0, 0, 0))],
        out_specs=pl.BlockSpec((1, TH, w), lambda n, r: (n, r, 0)),
        compiler_params=pltpu.CompilerParams(
            dimension_semantics=("parallel", "parallel"),
            vmem_limit_bytes=_VMEM_LIMIT),
    )(v, wf3)


def _bilinear_matrix(out_size, in_size):
    """PyTorch bilinear (align_corners=False) interpolation weights (out, in)."""
    M = np.zeros((out_size, in_size), np.float32)
    scale = in_size / out_size
    for d in range(out_size):
        src = (d + 0.5) * scale - 0.5
        src = max(src, 0.0)
        i0 = min(int(np.floor(src)), in_size - 1)
        i1 = min(i0 + 1, in_size - 1)
        l1 = src - i0
        M[d, i0] += 1.0 - l1
        M[d, i1] += l1
    return M


# -----------------------------------------------------------------------------
# Single fused tail kernel:
#   out = sigmoid( v1 . wf1  +  sum_i Ly_i @ s_i @ Lx_i  +  bias )
# Row-tiled over the output; no full-resolution HBM intermediates, nothing
# resident across the grid (v7x-VMEM friendly).
# -----------------------------------------------------------------------------
def combine_upsample_sigmoid(v1, wf1, side_maps, lys, lxs, bias, *, max_rows=1024):
    N, H, W, C1 = v1.shape
    side_dims = [(s.shape[1], s.shape[2]) for s in side_maps]
    n_sides = len(side_maps)

    rows_budget = _combine_rows_for_vmem(W, C1, side_dims, _VMEM_BUDGET)
    THo = _row_tile(H, min(max_rows, rows_budget),
                    min_tiles=2 if N == 1 else 1)

    wf1a = wf1.reshape(1, 1, C1).astype(jnp.float32)
    ba = jnp.asarray(bias, jnp.float32).reshape(1, 1)

    def kernel(*refs):
        v1_ref = refs[0]
        wf1_ref = refs[1]
        s_refs = refs[2:2 + n_sides]
        ly_refs = refs[2 + n_sides:2 + 2 * n_sides]
        lx_refs = refs[2 + 2 * n_sides:2 + 3 * n_sides]
        b_ref = refs[2 + 3 * n_sides]
        o_ref = refs[3 + 3 * n_sides]

        # Side 1: identity upsample -> just the folded channel reduce.
        acc = jnp.sum(v1_ref[0].astype(jnp.float32) * wf1_ref[...], axis=-1)
        # Sides 2..5: low-res score map -> row interp -> column interp (f32 MXU).
        for s_ref, ly_ref, lx_ref in zip(s_refs, ly_refs, lx_refs):
            t = jnp.dot(ly_ref[...], s_ref[0], preferred_element_type=jnp.float32)
            acc = acc + jnp.dot(t, lx_ref[...], preferred_element_type=jnp.float32)
        o_ref[0] = jax.nn.sigmoid(acc + b_ref[...])

    in_specs = [pl.BlockSpec((1, THo, W, C1), lambda n, r: (n, r, 0, 0)),
                pl.BlockSpec((1, 1, C1), lambda n, r: (0, 0, 0))]
    for (h_i, w_i) in side_dims:
        in_specs.append(pl.BlockSpec((1, h_i, w_i), lambda n, r: (n, 0, 0)))
    for (h_i, _) in side_dims:
        in_specs.append(pl.BlockSpec((THo, h_i), lambda n, r: (r, 0)))
    for (_, w_i) in side_dims:
        in_specs.append(pl.BlockSpec((w_i, W), lambda n, r: (0, 0)))
    in_specs.append(pl.BlockSpec((1, 1), lambda n, r: (0, 0)))

    return pl.pallas_call(
        kernel,
        out_shape=jax.ShapeDtypeStruct((N, H, W), jnp.float32),
        grid=(N, H // THo),
        in_specs=in_specs,
        out_specs=pl.BlockSpec((1, THo, W), lambda n, r: (n, r, 0)),
        compiler_params=pltpu.CompilerParams(
            dimension_semantics=("parallel", "parallel"),
            vmem_limit_bytes=_VMEM_LIMIT),
    )(v1, wf1a, *side_maps, *lys, *lxs, ba)


# -----------------------------------------------------------------------------
# Parameters (deterministic synthetic init; shapes follow the PyTorch module)
# -----------------------------------------------------------------------------
def init_params(key):
    conv_specs = {
        "vgg1_1": (3, 64), "vgg1_2": (64, 64),
        "vgg2_1": (64, 128), "vgg2_2": (128, 128),
        "vgg3_1": (128, 256), "vgg3_2": (256, 256), "vgg3_3": (256, 256),
        "vgg4_1": (256, 512), "vgg4_2": (512, 512), "vgg4_3": (512, 512),
        "vgg5_1": (512, 512), "vgg5_2": (512, 512), "vgg5_3": (512, 512),
    }
    score_specs = {"score1": 64, "score2": 128, "score3": 256,
                   "score4": 512, "score5": 512}
    keys = jax.random.split(key, len(conv_specs) + len(score_specs) + 1)
    params, ki = {}, 0
    for name, (cin, cout) in conv_specs.items():
        kw, kb = jax.random.split(keys[ki]); ki += 1
        w = jax.random.normal(kw, (3, 3, cin, cout), jnp.float32) / math.sqrt(9 * cin)
        bb = jax.random.normal(kb, (cout,), jnp.float32) * 0.01
        params[name] = (w, bb)
    for name, cin in score_specs.items():
        kw, kb = jax.random.split(keys[ki]); ki += 1
        w = jax.random.normal(kw, (cin,), jnp.float32) * (0.05 / math.sqrt(cin))
        bb = jax.random.normal(kb, (), jnp.float32) * 0.01
        params[name] = (w, bb)
    kw, kb = jax.random.split(keys[ki])
    params["combine"] = (jax.random.normal(kw, (5,), jnp.float32) * 0.2,
                         jax.random.normal(kb, (), jnp.float32) * 0.01)
    return params


# -----------------------------------------------------------------------------
# Full forward pass (mirrors Network.forward)
# -----------------------------------------------------------------------------
def hed_forward(x_nchw, p, *, max_rows=1024):
    N, C, H, W = x_nchw.shape
    assert C == 3
    assert H % 16 == 0 and W % 16 == 0, "kernel requires spatial dims % 16 == 0"
    x = jnp.transpose(x_nchw, (0, 2, 3, 1)).astype(jnp.float32)       # NCHW -> NHWC
    mean = jnp.array([104.00698793, 116.66876762, 122.67891434], jnp.float32)

    # --- vgg1_1: preprocess + Cin=3 im2col (K=27) repack in plain XLA, then a
    #     lane-dense Pallas matmul kernel (avoids (...,3)-minor DMAs).
    xp = x * 255.0 - mean
    xpad = jnp.pad(xp, ((0, 0), (1, 1), (1, 1), (0, 0)))
    x27 = jnp.concatenate([xpad[:, dy:dy + H, dx:dx + W, :]
                           for dy in range(3) for dx in range(3)],
                          axis=-1).astype(jnp.bfloat16)               # (N,H,W,27)
    w11, b11 = p["vgg1_1"]
    v1 = pointwise_conv_relu(x27, w11.reshape(27, -1), b11, max_rows=max_rows)
    v1 = conv3x3(v1, *p["vgg1_2"], max_rows=max_rows)

    # --- VGG backbone: maxpool fused into the first conv of every stage.
    v2 = conv3x3(v1, *p["vgg2_1"], pool=True, max_rows=max_rows)
    v2 = conv3x3(v2, *p["vgg2_2"], max_rows=max_rows)

    v3 = conv3x3(v2, *p["vgg3_1"], pool=True, max_rows=max_rows)
    v3 = conv3x3(v3, *p["vgg3_2"], max_rows=max_rows)
    v3 = conv3x3(v3, *p["vgg3_3"], max_rows=max_rows)

    v4 = conv3x3(v3, *p["vgg4_1"], pool=True, max_rows=max_rows)
    v4 = conv3x3(v4, *p["vgg4_2"], max_rows=max_rows)
    v4 = conv3x3(v4, *p["vgg4_3"], max_rows=max_rows)

    v5 = conv3x3(v4, *p["vgg5_1"], pool=True, max_rows=max_rows)
    v5 = conv3x3(v5, *p["vgg5_2"], max_rows=max_rows)
    v5 = conv3x3(v5, *p["vgg5_3"], max_rows=max_rows)

    # --- Score/upsample/combine tail, algebraically folded:
    #   sigmoid(sum_i cw_i * U_i(v_i.sw_i + sb_i) + cb)
    # = sigmoid(v1.(cw_1*sw_1) + sum_{i>=2} U_i(v_i.(cw_i*sw_i))
    #           + (cb + sum_i cw_i*sb_i))
    cw, cb = p["combine"]
    names = ["score1", "score2", "score3", "score4", "score5"]
    total_bias = cb
    for i, name in enumerate(names):
        total_bias = total_bias + cw[i] * p[name][1]

    wf1 = p["score1"][0] * cw[0]
    side_feats = [v2, v3, v4, v5]
    s_maps = [score_map(v, p[names[i + 1]][0] * cw[i + 1], max_rows=max_rows)
              for i, v in enumerate(side_feats)]
    lys = [jnp.asarray(_bilinear_matrix(H, v.shape[1])) for v in side_feats]
    lxs = [jnp.asarray(_bilinear_matrix(W, v.shape[2]).T) for v in side_feats]

    out = combine_upsample_sigmoid(v1, wf1, s_maps, lys, lxs, total_bias,
                                   max_rows=max_rows)                 # (N, H, W)
    return out[:, None, :, :]                                         # -> NCHW


# -----------------------------------------------------------------------------
# Pure-JAX reference (for in-script numerical verification)
# -----------------------------------------------------------------------------
def reference_forward(x_nchw, p):
    x = jnp.transpose(x_nchw, (0, 2, 3, 1)).astype(jnp.float32)
    N, H, W, _ = x.shape
    mean = jnp.array([104.00698793, 116.66876762, 122.67891434], jnp.float32)
    x = x * 255.0 - mean

    def conv(v, w, b):
        y = jax.lax.conv_general_dilated(
            v, w, (1, 1), "SAME",
            dimension_numbers=("NHWC", "HWIO", "NHWC"),
            precision=jax.lax.Precision.HIGHEST)
        return jnp.maximum(y + b, 0.0)

    def pool(v):
        n, h, w_, c = v.shape
        return v.reshape(n, h // 2, 2, w_ // 2, 2, c).max(axis=(2, 4))

    v1 = conv(conv(x, *p["vgg1_1"]), *p["vgg1_2"])
    v2 = conv(conv(pool(v1), *p["vgg2_1"]), *p["vgg2_2"])
    v3 = conv(conv(conv(pool(v2), *p["vgg3_1"]), *p["vgg3_2"]), *p["vgg3_3"])
    v4 = conv(conv(conv(pool(v3), *p["vgg4_1"]), *p["vgg4_2"]), *p["vgg4_3"])
    v5 = conv(conv(conv(pool(v4), *p["vgg5_1"]), *p["vgg5_2"]), *p["vgg5_3"])

    def up(s, Ho, Wo):
        n, h, w_ = s.shape
        if (h, w_) == (Ho, Wo):
            return s
        ly = jnp.asarray(_bilinear_matrix(Ho, h))
        lx = jnp.asarray(_bilinear_matrix(Wo, w_))
        return jnp.einsum("oh,nhw,pw->nop", ly, s, lx,
                          precision=jax.lax.Precision.HIGHEST)

    cw, cb = p["combine"]
    feats = [v1, v2, v3, v4, v5]
    names = ["score1", "score2", "score3", "score4", "score5"]
    logit = cb
    for i, (v, name) in enumerate(zip(feats, names)):
        sw, sb = p[name]
        s = jnp.einsum("nhwc,c->nhw", v, sw,
                       precision=jax.lax.Precision.HIGHEST) + sb
        logit = logit + cw[i] * up(s, H, W)
    return jax.nn.sigmoid(logit)                                       # (N, H, W)


# -----------------------------------------------------------------------------
if __name__ == "__main__":
    key = jax.random.PRNGKey(0)
    k_x, k_p = jax.random.split(key)

    N, C, H, W = 2, 3, 32, 32
    x = jax.random.uniform(k_x, (N, C, H, W), jnp.float32)   # image-like in [0,1]
    params = init_params(k_p)

    # max_rows=8 keeps tiles small at this demo size so the multi-tile halo
    # paths (including the fused-maxpool halo) are actually exercised.
    out = hed_forward(x, params, max_rows=8)
    out = jax.block_until_ready(out)

    assert out.shape == (N, 1, H, W), out.shape
    assert bool(jnp.all(jnp.isfinite(out)))
    assert bool(jnp.all((out >= 0.0) & (out <= 1.0)))        # sigmoid output

    ref = reference_forward(x, params)
    err = float(jnp.max(jnp.abs(out[:, 0] - ref)))
    assert err < 3e-2, f"max abs diff vs f32 reference: {err}"

    print("KERNEL_OK")
</pallas_src>

<mosaic_0001>
module attributes {stable_mosaic.version = 11 : i64} {
  func.func @kernel(%arg0: i32, %arg1: i32, %arg2: memref<1x8x32x27xbf16, #tpu.memory_space<vmem>>, %arg3: memref<27x64xbf16, #tpu.memory_space<vmem>>, %arg4: memref<1x64xf32, #tpu.memory_space<vmem>>, %arg5: memref<1x8x32x64xbf16, #tpu.memory_space<vmem>>) attributes {dimension_semantics = [#tpu.dimension_semantics<parallel>, #tpu.dimension_semantics<parallel>], iteration_bounds = array<i64: 2, 4>, scalar_prefetch = 0 : i64, scratch_operands = 0 : i64, tpu.core_type = #tpu.core_type<tc>, window_params = [{transform_indices = @transform_0, window_bounds = array<i64: 1, 8, 32, 27>}, {pipeline_mode = #tpu.pipeline_mode<synchronous>, transform_indices = @transform_1, window_bounds = array<i64: 27, 64>}, {pipeline_mode = #tpu.pipeline_mode<synchronous>, transform_indices = @transform_2, window_bounds = array<i64: 1, 64>}, {transform_indices = @transform_3, window_bounds = array<i64: 1, 8, 32, 64>}]} {
    %c0 = arith.constant 0 : index
    %c0_0 = arith.constant 0 : index
    %c0_1 = arith.constant 0 : index
    %c0_2 = arith.constant 0 : index
    %0 = vector.load %arg2[%c0, %c0_0, %c0_1, %c0_2] : memref<1x8x32x27xbf16, #tpu.memory_space<vmem>>, vector<1x8x32x27xbf16>
    %1 = vector.shape_cast %0 : vector<1x8x32x27xbf16> to vector<8x32x27xbf16>
    %2 = vector.shape_cast %1 : vector<8x32x27xbf16> to vector<256x27xbf16>
    %c0_3 = arith.constant 0 : index
    %c0_4 = arith.constant 0 : index
    %3 = vector.load %arg3[%c0_3, %c0_4] : memref<27x64xbf16, #tpu.memory_space<vmem>>, vector<27x64xbf16>
    %cst = arith.constant dense<0.000000e+00> : vector<256x64xf32>
    %4 = tpu.matmul %2, %3, %cst {dimension_numbers = #tpu.dot_dimension_numbers<[1], [0], [0], [1], [0, 0, 1, 1], [], []>} : vector<256x27xbf16>, vector<27x64xbf16>, vector<256x64xf32> -> vector<256x64xf32>
    %c0_5 = arith.constant 0 : index
    %c0_6 = arith.constant 0 : index
    %5 = vector.load %arg4[%c0_5, %c0_6] : memref<1x64xf32, #tpu.memory_space<vmem>>, vector<1x64xf32>
    %6 = vector.broadcast %5 : vector<1x64xf32> to vector<256x64xf32>
    %7 = arith.addf %4, %6 : vector<256x64xf32>
    %cst_7 = arith.constant 0.000000e+00 : f32
    %8 = vector.broadcast %cst_7 : f32 to vector<256x64xf32>
    %9 = arith.maximumf %7, %8 : vector<256x64xf32>
    %10 = vector.shape_cast %9 : vector<256x64xf32> to vector<8x32x64xf32>
    %11 = arith.truncf %10 : vector<8x32x64xf32> to vector<8x32x64xbf16>
    %c0_8 = arith.constant 0 : index
    %c0_9 = arith.constant 0 : index
    %c0_10 = arith.constant 0 : index
    %c0_11 = arith.constant 0 : index
    %12 = vector.load %arg5[%c0_8, %c0_9, %c0_10, %c0_11] : memref<1x8x32x64xbf16, #tpu.memory_space<vmem>>, vector<1x8x32x64xbf16>
    %13 = vector.shape_cast %12 : vector<1x8x32x64xbf16> to vector<8x32x64xbf16>
    %14 = vector.shape_cast %11 : vector<8x32x64xbf16> to vector<1x8x32x64xbf16>
    tpu.vector_store %arg5[%c0_8, %c0_9, %c0_10, %c0_11], %14 {strides = array<i32>} : memref<1x8x32x64xbf16, #tpu.memory_space<vmem>>, vector<1x8x32x64xbf16>,
    return
  }
  func.func @transform_0(%arg0: i32, %arg1: i32) -> (i32, i32, i32, i32) {
    %c0_i32 = arith.constant 0 : i32
    %c0_i32_0 = arith.constant 0 : i32
    %c0_i32_1 = arith.constant 0 : i32
    return %arg0, %arg1, %c0_i32, %c0_i32_0 : i32, i32, i32, i32
  }
  func.func @transform_1(%arg0: i32, %arg1: i32) -> (i32, i32) {
    %c0_i32 = arith.constant 0 : i32
    %c0_i32_0 = arith.constant 0 : i32
    %c0_i32_1 = arith.constant 0 : i32
    return %c0_i32, %c0_i32_0 : i32, i32
  }
  func.func @transform_2(%arg0: i32, %arg1: i32) -> (i32, i32) {
    %c0_i32 = arith.constant 0 : i32
    %c0_i32_0 = arith.constant 0 : i32
    %c0_i32_1 = arith.constant 0 : i32
    return %c0_i32, %c0_i32_0 : i32, i32
  }
  func.func @transform_3(%arg0: i32, %arg1: i32) -> (i32, i32, i32, i32) {
    %c0_i32 = arith.constant 0 : i32
    %c0_i32_0 = arith.constant 0 : i32
    %c0_i32_1 = arith.constant 0 : i32
    return %arg0, %arg1, %c0_i32, %c0_i32_0 : i32, i32, i32, i32
  }
}

</mosaic_0001>

<bundles_post_ra>
// kernel: tpu_custom_call.1
= control target key start
LH: loop header
LB: loop body
LE: loop exit
PB: predicated region body
PF: predicated region fallthrough
CT: control target
= control target key end

     0   :  { %8 = vsyncpa [#allocation3], 0  ;;  %s1527_s0 = inlined_call_operand.vmem [shape: bf16[2,32,32,27], index: 0, kind: input, shape index: {}]   ;;  %s1528_s1 = inlined_call_operand.vmem [shape: bf16[27,64], index: 1, kind: input, shape index: {}]   ;;  %s1529_s2 = inlined_call_operand.vmem [shape: f32[1,64], index: 2, kind: input, shape index: {}]   ;;  %s1530_s3 = inlined_call_operand.hbm [shape: bf16[2,32,32,64], index: 3, kind: output, shape index: {}]  }
   0x1   :  { %10 = vsyncpa [#allocation3 + $0x1], 0  ;;  %s1237_s12 = smov 0   ;;  %s1239_s13 = smov 0  }
   0x2   :  { %s1241_s14 = smov 0   ;;  %s1243_s15 = smov 0  }
   0x3   :  { %s1245_s16 = smov 0   ;;  %s1247_s17 = smov 0  }
   0x4   :  { %s1249_s18 = smov 0   ;;  %s1251_s19 = smov 0  }
   0x5 LB: > { %s850_s20 = sadd.s32 4294967295, %s1211_s19   ;;  %s851_s21 = sadd.s32 4294967294, %s1211_s19   ;;  %s1211_s19 = sphi %s1251_s19, %s16_s19   ;;  %s1207_s18 = sphi %s1249_s18, %s1539_s18   ;;  %s1203_s17 = sphi %s1247_s17, %s1538_s17   ;;  %s1199_s16 = sphi %s1245_s16, %s1537_s16   ;;  %s1195_s15 = sphi %s1243_s15, %s1536_s15   ;;  %s1191_s14 = sphi %s1241_s14, %s1535_s14   ;;  %s1187_s13 = sphi %s1239_s13, %s1534_s13   ;;  %s1183_s12 = sphi %s1237_s12, %s1533_s12  }
   0x6   : > { %s25_s22 = sadd.s32 1, %s1203_s17  ;;  %s28_s23 = sadd.s32 1, %s1207_s18 }
   0x7   : > { %p26_p0 = scmp.ge.s32.totalorder %s25_s22, 4  ;;  %p117_p1 = scmp.ne.s32.totalorder %s1191_s14, %s1187_s13 }
   0x8   : > { %p118_p2 = scmp.eq.s32.totalorder %s850_s20, 7  ;;  %p123_p5 = scmp.ne.s32.totalorder %s1187_s13, %s1183_s12 }
   0x9   : > { %s1541_s22 = smov (%p26_p0, %s25_s22), 0  ;;  %s1543_s23 = smov (!%p26_p0, %s28_s23), %s1207_s18 }
   0xa   : > { %s103_s24 = ssub.s32 %s1203_s17, %s1541_s22  ;;  %p1288_p3 = por %p118_p2, %p117_p1 }
   0xb   : > { %p30_p4 = scmp.ge.s32.totalorder %s1543_s23, 2  ;;  %p124_p6 = scmp.eq.s32.totalorder %s851_s21, 7 }
   0xc   : > { %p854_p7 = scmp.ge.s32.totalorder %s1211_s19, 1  ;;  %p162_p9 = scmp.lt.s32.totalorder %s1211_s19, 9 }
   0xd   : > { %s1545_s23 = smov (%p30_p4, %s1543_s23), 0  ;;  %p1297_p8 = por %p124_p6, %p123_p5 }
   0xe   : > { %s102_s27 = ssub.s32 %s1207_s18, %s1545_s23  ;;  %s107_s28 = sadd.s32 1, %s1191_s14 }
   0xf   : > { %s104_s29 = sor.u32 %s103_s24, %s102_s27  ;;  %p163_p10 = pnand %p854_p7, %p162_p9 }
  0x10   : > { %p105_p11 = scmp.eq.s32.totalorder %s104_s29, 0  ;;  %v1099_v0 = vld [vmem:[%s1528_s1] sm:$0xff] (!%p163_p10)   ;;  %vm387_vm0 = vcmask (!%p163_p10), 1044480   ;;  %v1100_v1 = vld [vmem:[%s1528_s1 + $0x8] sm:$0x3f] (!%p163_p10)   ;;  %vm388_vm1 = vcmask (!%p163_p10), 1045504  }
  0x11   : > { %166 = sbr.rel (%p163_p10) target bundleno = 293 (0x125), region = 32  ;;  %985 = vmatprep.subr.bf16.mxu0 (!%p163_p10), %v1099_v0  ;;  %1021 = vmatprep.subr.bf16.mxu1 (!%p163_p10), %v1099_v0  ;;  %s856_s8 = sshll.u32 (!%p163_p10), %s1195_s15, 3  ;;  %v1213_v2 = vmov (!%p163_p10), 65535   ;;  %vm338_vm2 = vcmask (!%p163_p10), 220160   ;;  %v1358_v22 = vld [vmem:[%s1529_s2] ss:$0 sm:$0xff] (!%p163_p10) }
  0x12   : > { %s1306_s30 = scalar_select %p105_p11, %s1191_s14, %s107_s28  }
  0x13   : > { %p192_p12 = scmp.lt.s32.totalorder (!%p163_p10), %s1199_s16, 1  ;;  %986 = vmatpush3.bf16.msra.mxu0 (!%p163_p10), %v1099_v0  ;;  %1023 = vmatpush3.bf16.msra.mxu1 (!%p163_p10), %v1099_v0  ;;  %v389_v3 = vsel (!%p163_p10), %vm387_vm0, 4294967295, %v1213_v2  ;;  %p194_p13 = scmp.lt.s32.totalorder (!%p163_p10), %s856_s8, 31  ;;  %vm715_vm3 = vcmask (!%p163_p10), 519168  }
  0x14   : > { %v390_v4 = vsel (!%p163_p10), %vm388_vm1, %v389_v3, 0  ;;  %s188_s29 = sand.u32 (!%p163_p10), 1, %s1187_s13  }
  0x15   : > { %v392_v5 = vand.u32 (!%p163_p10), %v1100_v1, %v390_v4  ;;  %s855_s6 = sshll.u32 (!%p163_p10), %s188_s29, 7  ;;  %s1475_s24 = scalar_lea.sflag (!%p163_p10), [#allocation3], %s188_s29 }
  0x16   : > { %s1370_s7 = scalar_lea.vmem (!%p163_p10), [#allocation2], %s855_s6 }
  0x17   : > { %987 = vmatprep.subr.bf16.mxu0 (!%p163_p10), %v392_v5  ;;  %1022 = vmatprep.subr.bf16.mxu1 (!%p163_p10), %v392_v5 }
  0x18   : > { %s193_s9 = scalar_select %p192_p12, %s1199_s16, 1  ;;  %988 = vmatpush3.bf16.msra.mxu0 %v392_v5  ;;  %1024 = vmatpush3.bf16.msra.mxu1 %v392_v5 }
  0x19   : > { %s1547_s8 = smov (!%p194_p13, %s856_s8), 31 }
  0x1a   : > { %s858_s10 = sshll.u32 %s193_s9, 7  ;;  %s857_s11 = sshll.u32 %s1547_s8, 2 }
  0x1b   : > { %s198_s20 = sadd.s32 %s858_s10, %s857_s11  ;;  %s966_s8 = sshll.u32 %s1195_s15, 5 }
  0x1c   : > { %s859_s21 = sshll.u32 %s198_s20, 2  ;;  %s930_s9 = sshll.u32 %s1199_s16, 7 }
  0x1d   : > { %s1320_s28 = scalar_lea.vmem %s1527_s0, %s859_s21  ;;  %s1439_s15 = sadd.s32 %s966_s8, %s930_s9 }
  0x1e   : > { %v1101_v6 = vld [vmem:[%s1320_s28] sm:$0xff]   ;;  %v1103_v8 = vld [vmem:[%s1320_s28 + $0x8] sm:$0xff]   ;;  %v1105_v10 = vld [vmem:[%s1320_s28 + $0x10] sm:$0xff]   ;;  %s931_s16 = sshll.u32 %s1439_s15, 6  ;;  %s765_s10 = sshll.u32 %s1370_s7, 4  ;;  %s1461_s10 = int_to_ptr.vmem [resolvable:$true] %s765_s10 }
  0x1f   : > { %v1102_v7 = vld [vmem:[%s1320_s28 + $0x40] sm:$0xff]   ;;  %989 = vmatprep.mubr.msk.bf16.mxu0 %vm338_vm2, %v1101_v6  ;;  %v1104_v9 = vld [vmem:[%s1320_s28 + $0x48] sm:$0xff]   ;;  %v1106_v11 = vld [vmem:[%s1320_s28 + $0x50] sm:$0xff]   ;;  %s1459_s21 = scalar_lea.hbm %s1530_s3, %s931_s16  ;;  %s1117_s27 = scalar_lea.vmem %s1461_s10, 2048 }
  0x20   : > { %1005 = vmatprep.mubr.msk.bf16.mxu1 %vm338_vm2, %v1102_v7  ;;  %990 = vmatmul.mubr.msk.bf16.vlgmr.msra.gmra.mrb[0].mxu0 %vm338_vm2, %v1103_v8  ;;  %v1107_v12 = vld [vmem:[%s1320_s28 + $0x18] sm:$0xff]   ;;  %v1109_v14 = vld [vmem:[%s1320_s28 + $0x20] sm:$0xff]   ;;  %v1111_v16 = vld [vmem:[%s1320_s28 + $0x28] sm:$0xff]   ;;  %p1118_p0 = scmp.ne.s32.totalorder %s1461_s10, %s1117_s27 }
  0x21   : > { %1006 = vmatmul.mubr.msk.bf16.vlgmr.msra.gmra.mrb[0].mxu1 %vm338_vm2, %v1104_v9  ;;  %993 = vmatprep.mubr.msk.bf16.mxu0 %vm338_vm2, %v1105_v10  ;;  %v1108_v13 = vld [vmem:[%s1320_s28 + $0x58] sm:$0xff]   ;;  %v1110_v15 = vld [vmem:[%s1320_s28 + $0x60] sm:$0xff]   ;;  %v1112_v17 = vld [vmem:[%s1320_s28 + $0x68] sm:$0xff]  }
  0x22   : > { %1009 = vmatprep.mubr.msk.bf16.mxu1 %vm338_vm2, %v1106_v11  ;;  %v1113_v18 = vld [vmem:[%s1320_s28 + $0x30] sm:$0xff]   ;;  %v1115_v20 = vld [vmem:[%s1320_s28 + $0x38] sm:$0xff]   ;;  %p1119_p1 = pnand %p1118_p0, %p1288_p3 }
  0x23   : > { %v1114_v19 = vld [vmem:[%s1320_s28 + $0x70] sm:$0xff]   ;;  %v1116_v21 = vld [vmem:[%s1320_s28 + $0x78] sm:$0xff]   ;;  %s1214_s28 = smov [#allocation2]  }
  0x24   : > { %p1120_p2 = pneg %p1119_p1  ;;  %s1121_s4 = sshll.u32 %s1214_s28, 4  ;;  %s1122_s4 = int_to_ptr.vmem [resolvable:$false] %s1121_s4 }
  0x25   : > { %s1123_s5 = scalar_lea.vmem %s1122_s4, 4096  ;;  %p1124_p4 = scmp.lt.s32.totalorder %s1461_s10, %s1122_s4 }
  0x26   : > { %p1125_p5 = scmp.lt.s32.totalorder %s1123_s5, %s1117_s27 }
  0x28   : > { %994 = vmatmul.mubr.msk.bf16.gmra.mrb[4].mxu0 %vm338_vm2, %v1107_v12  ;;  %p1126_p6 = por %p1125_p5, %p1124_p4 }
  0x29   : > { %1010 = vmatmul.mubr.msk.bf16.gmra.mrb[4].mxu1 %vm338_vm2, %v1108_v13  ;;  %997 = vmatprep.mubr.msk.bf16.mxu0 %vm338_vm2, %v1109_v14 }
  0x2a   : > { %1013 = vmatprep.mubr.msk.bf16.mxu1 %vm338_vm2, %v1110_v15  ;;  %p1127_p7 = pnand %p1126_p6, %p1120_p2 }
  0x30   : > { %998 = vmatmul.mubr.msk.bf16.gmra.mrb[8].mxu0 %vm338_vm2, %v1111_v16 }
  0x31   : > { %1014 = vmatmul.mubr.msk.bf16.gmra.mrb[8].mxu1 %vm338_vm2, %v1112_v17  ;;  %1001 = vmatprep.mubr.msk.bf16.mxu0 %vm338_vm2, %v1113_v18 }
  0x32   : > { %1017 = vmatprep.mubr.msk.bf16.mxu1 %vm338_vm2, %v1114_v19 }
  0x38   : > { %1002 = vmatmul.mubr.msk.bf16.gmra.mrb[12].mxu0 %vm338_vm2, %v1115_v20 }
  0x39   : > { %1018 = vmatmul.mubr.msk.bf16.gmra.mrb[12].mxu1 %vm338_vm2, %v1116_v21 }
  0xf3   : > { %v991_v23 = vpop.f32.mrb[0].mxu0 }
  0xf4   : > { %v437_v24 = vadd.f32 %v991_v23, %v1358_v22  ;;  %v1007_v25 = vpop.f32.mrb[0].mxu1  ;;  %v428_v26 = vpop.f32.mrb[1].mxu0 }
  0xf5   : > { %v501_v27 = vadd.f32 %v1007_v25, %v1358_v22  ;;  %v429_v28 = vadd.f32 %v1358_v22, %v428_v26  ;;  %v492_v29 = vpop.f32.mrb[1].mxu1  ;;  %v992_v30 = vpop.f32.mrb[2].mxu0 }
  0xf6   : > { %v557_v31 = vmax.f32 %v437_v24, 0.0  ;;  %v493_v32 = vadd.f32 %v1358_v22, %v492_v29  ;;  %v440_v33 = vadd.f32 %v992_v30, %v1358_v22  ;;  %v1008_v34 = vpop.f32.mrb[2].mxu1  ;;  %v431_v35 = vpop.f32.mrb[3].mxu0 }
  0xf7   : > { %v573_v36 = vmax.f32 %v501_v27, 0.0  ;;  %v555_v37 = vmax.f32 %v429_v28, 0.0  ;;  %v504_v38 = vadd.f32 %v1008_v34, %v1358_v22  ;;  %v432_v39 = vadd.f32 %v1358_v22, %v431_v35  ;;  %v495_v40 = vpop.f32.mrb[3].mxu1 }
  0xf8   : > { %v936_v41 = vpack.c.bf16 %v557_v31, %v557_v31  ;;  %v571_v42 = vmax.f32 %v493_v32, 0.0  ;;  %v558_v43 = vmax.f32 %v440_v33, 0.0  ;;  %v496_v44 = vadd.f32 %v1358_v22, %v495_v40 }
  0xf9   : > { %v952_v45 = vpack.c.bf16 %v573_v36, %v573_v36  ;;  %v934_v46 = vpack.c.bf16 %v555_v37, %v555_v37  ;;  %v574_v47 = vmax.f32 %v504_v38, 0.0  ;;  %v556_v48 = vmax.f32 %v432_v39, 0.0 }
  0xfa   : > { %718 = vst.msk [vmem:[%s1370_s7 + $0x8] sm:$0xf] %vm715_vm3, %v936_v41  ;;  %v950_v49 = vpack.c.bf16 %v571_v42, %v571_v42  ;;  %v937_v50 = vpack.c.bf16 %v558_v43, %v558_v43  ;;  %v572_v51 = vmax.f32 %v496_v44, 0.0 }
  0xfb   : > { %734 = vst.msk [vmem:[%s1370_s7 + $0x48] sm:$0xf] %vm715_vm3, %v952_v45  ;;  %716 = vst.msk [vmem:[%s1370_s7] sm:$0xf] %vm715_vm3, %v934_v46  ;;  %v953_v52 = vpack.c.bf16 %v574_v47, %v574_v47  ;;  %v935_v53 = vpack.c.bf16 %v556_v48, %v556_v48  ;;  %v995_v54 = vpop.f32.mrb[4].mxu0 }
  0xfc   : > { %732 = vst.msk [vmem:[%s1370_s7 + $0x40] sm:$0xf] %vm715_vm3, %v950_v49  ;;  %719 = vst.msk [vmem:[%s1370_s7 + $0xc] sm:$0xf] %vm715_vm3, %v937_v50  ;;  %v951_v55 = vpack.c.bf16 %v572_v51, %v572_v51  ;;  %v453_v56 = vadd.f32 %v995_v54, %v1358_v22  ;;  %v1011_v57 = vpop.f32.mrb[4].mxu1  ;;  %v444_v58 = vpop.f32.mrb[5].mxu0 }
  0xfd   : > { %735 = vst.msk [vmem:[%s1370_s7 + $0x4c] sm:$0xf] %vm715_vm3, %v953_v52  ;;  %717 = vst.msk [vmem:[%s1370_s7 + $0x4] sm:$0xf] %vm715_vm3, %v935_v53  ;;  %v517_v59 = vadd.f32 %v1011_v57, %v1358_v22  ;;  %v445_v60 = vadd.f32 %v1358_v22, %v444_v58  ;;  %v508_v61 = vpop.f32.mrb[5].mxu1  ;;  %v996_v62 = vpop.f32.mrb[6].mxu0 }
  0xfe   : > { %733 = vst.msk [vmem:[%s1370_s7 + $0x44] sm:$0xf] %vm715_vm3, %v951_v55  ;;  %v561_v63 = vmax.f32 %v453_v56, 0.0  ;;  %v509_v0 = vadd.f32 %v1358_v22, %v508_v61  ;;  %v456_v1 = vadd.f32 %v996_v62, %v1358_v22  ;;  %v1012_v2 = vpop.f32.mrb[6].mxu1  ;;  %v447_v3 = vpop.f32.mrb[7].mxu0 }
  0xff   : > { %v577_v4 = vmax.f32 %v517_v59, 0.0  ;;  %v559_v5 = vmax.f32 %v445_v60, 0.0  ;;  %v520_v6 = vadd.f32 %v1012_v2, %v1358_v22  ;;  %v448_v7 = vadd.f32 %v1358_v22, %v447_v3  ;;  %v511_v8 = vpop.f32.mrb[7].mxu1 }
 0x100   : > { %v940_v9 = vpack.c.bf16 %v561_v63, %v561_v63  ;;  %v575_v10 = vmax.f32 %v509_v0, 0.0  ;;  %v562_v11 = vmax.f32 %v456_v1, 0.0  ;;  %v512_v12 = vadd.f32 %v1358_v22, %v511_v8 }
 0x101   : > { %v956_v13 = vpack.c.bf16 %v577_v4, %v577_v4  ;;  %v938_v14 = vpack.c.bf16 %v559_v5, %v559_v5  ;;  %v578_v15 = vmax.f32 %v520_v6, 0.0  ;;  %v560_v16 = vmax.f32 %v448_v7, 0.0 }
 0x102   : > { %722 = vst.msk [vmem:[%s1370_s7 + $0x18] sm:$0xf] %vm715_vm3, %v940_v9  ;;  %v954_v17 = vpack.c.bf16 %v575_v10, %v575_v10  ;;  %v941_v18 = vpack.c.bf16 %v562_v11, %v562_v11  ;;  %v576_v19 = vmax.f32 %v512_v12, 0.0 }
 0x103   : > { %738 = vst.msk [vmem:[%s1370_s7 + $0x58] sm:$0xf] %vm715_vm3, %v956_v13  ;;  %720 = vst.msk [vmem:[%s1370_s7 + $0x10] sm:$0xf] %vm715_vm3, %v938_v14  ;;  %v957_v20 = vpack.c.bf16 %v578_v15, %v578_v15  ;;  %v939_v21 = vpack.c.bf16 %v560_v16, %v560_v16  ;;  %v999_v23 = vpop.f32.mrb[8].mxu0 }
 0x104   : > { %736 = vst.msk [vmem:[%s1370_s7 + $0x50] sm:$0xf] %vm715_vm3, %v954_v17  ;;  %723 = vst.msk [vmem:[%s1370_s7 + $0x1c] sm:$0xf] %vm715_vm3, %v941_v18  ;;  %v955_v24 = vpack.c.bf16 %v576_v19, %v576_v19  ;;  %v469_v25 = vadd.f32 %v999_v23, %v1358_v22  ;;  %v1015_v26 = vpop.f32.mrb[8].mxu1  ;;  %v460_v27 = vpop.f32.mrb[9].mxu0 }
 0x105   : > { %739 = vst.msk [vmem:[%s1370_s7 + $0x5c] sm:$0xf] %vm715_vm3, %v957_v20  ;;  %721 = vst.msk [vmem:[%s1370_s7 + $0x14] sm:$0xf] %vm715_vm3, %v939_v21  ;;  %v533_v28 = vadd.f32 %v1015_v26, %v1358_v22  ;;  %v461_v29 = vadd.f32 %v1358_v22, %v460_v27  ;;  %v524_v30 = vpop.f32.mrb[9].mxu1  ;;  %v1000_v31 = vpop.f32.mrb[10].mxu0 }
 0x106   : > { %737 = vst.msk [vmem:[%s1370_s7 + $0x54] sm:$0xf] %vm715_vm3, %v955_v24  ;;  %v565_v32 = vmax.f32 %v469_v25, 0.0  ;;  %v525_v33 = vadd.f32 %v1358_v22, %v524_v30  ;;  %v472_v34 = vadd.f32 %v1000_v31, %v1358_v22  ;;  %v1016_v35 = vpop.f32.mrb[10].mxu1  ;;  %v463_v36 = vpop.f32.mrb[11].mxu0 }
 0x107   : > { %v581_v37 = vmax.f32 %v533_v28, 0.0  ;;  %v563_v38 = vmax.f32 %v461_v29, 0.0  ;;  %v536_v39 = vadd.f32 %v1016_v35, %v1358_v22  ;;  %v464_v40 = vadd.f32 %v1358_v22, %v463_v36  ;;  %v527_v41 = vpop.f32.mrb[11].mxu1 }
 0x108   : > { %v944_v42 = vpack.c.bf16 %v565_v32, %v565_v32  ;;  %v579_v43 = vmax.f32 %v525_v33, 0.0  ;;  %v566_v44 = vmax.f32 %v472_v34, 0.0  ;;  %v528_v45 = vadd.f32 %v1358_v22, %v527_v41 }
 0x109   : > { %v960_v46 = vpack.c.bf16 %v581_v37, %v581_v37  ;;  %v942_v47 = vpack.c.bf16 %v563_v38, %v563_v38  ;;  %v582_v48 = vmax.f32 %v536_v39, 0.0  ;;  %v564_v49 = vmax.f32 %v464_v40, 0.0 }
 0x10a   : > { %726 = vst.msk [vmem:[%s1370_s7 + $0x28] sm:$0xf] %vm715_vm3, %v944_v42  ;;  %v958_v50 = vpack.c.bf16 %v579_v43, %v579_v43  ;;  %v945_v51 = vpack.c.bf16 %v566_v44, %v566_v44  ;;  %v580_v52 = vmax.f32 %v528_v45, 0.0 }
 0x10b   : > { %742 = vst.msk [vmem:[%s1370_s7 + $0x68] sm:$0xf] %vm715_vm3, %v960_v46  ;;  %724 = vst.msk [vmem:[%s1370_s7 + $0x20] sm:$0xf] %vm715_vm3, %v942_v47  ;;  %v961_v53 = vpack.c.bf16 %v582_v48, %v582_v48  ;;  %v943_v54 = vpack.c.bf16 %v564_v49, %v564_v49  ;;  %v1003_v55 = vpop.f32.mrb[12].mxu0 }
 0x10c   : > { %740 = vst.msk [vmem:[%s1370_s7 + $0x60] sm:$0xf] %vm715_vm3, %v958_v50  ;;  %727 = vst.msk [vmem:[%s1370_s7 + $0x2c] sm:$0xf] %vm715_vm3, %v945_v51  ;;  %v959_v56 = vpack.c.bf16 %v580_v52, %v580_v52  ;;  %v485_v57 = vadd.f32 %v1003_v55, %v1358_v22  ;;  %v1019_v58 = vpop.f32.mrb[12].mxu1  ;;  %v476_v59 = vpop.f32.mrb[13].mxu0 }
 0x10d   : > { %743 = vst.msk [vmem:[%s1370_s7 + $0x6c] sm:$0xf] %vm715_vm3, %v961_v53  ;;  %725 = vst.msk [vmem:[%s1370_s7 + $0x24] sm:$0xf] %vm715_vm3, %v943_v54  ;;  %v549_v60 = vadd.f32 %v1019_v58, %v1358_v22  ;;  %v477_v61 = vadd.f32 %v1358_v22, %v476_v59  ;;  %v540_v62 = vpop.f32.mrb[13].mxu1  ;;  %v1004_v63 = vpop.f32.mrb[14].mxu0 }
 0x10e   : > { %741 = vst.msk [vmem:[%s1370_s7 + $0x64] sm:$0xf] %vm715_vm3, %v959_v56  ;;  %v569_v0 = vmax.f32 %v485_v57, 0.0  ;;  %v541_v1 = vadd.f32 %v1358_v22, %v540_v62  ;;  %v488_v2 = vadd.f32 %v1004_v63, %v1358_v22  ;;  %v1020_v3 = vpop.f32.mrb[14].mxu1  ;;  %v479_v4 = vpop.f32.mrb[15].mxu0 }
 0x10f   : > { %v585_v5 = vmax.f32 %v549_v60, 0.0  ;;  %v567_v6 = vmax.f32 %v477_v61, 0.0  ;;  %v552_v7 = vadd.f32 %v1020_v3, %v1358_v22  ;;  %v480_v8 = vadd.f32 %v1358_v22, %v479_v4  ;;  %v543_v9 = vpop.f32.mrb[15].mxu1 }
 0x110   : > { %v948_v10 = vpack.c.bf16 %v569_v0, %v569_v0  ;;  %v583_v11 = vmax.f32 %v541_v1, 0.0  ;;  %v570_v12 = vmax.f32 %v488_v2, 0.0  ;;  %v544_v13 = vadd.f32 %v1358_v22, %v543_v9 }
 0x111   : > { %v964_v14 = vpack.c.bf16 %v585_v5, %v585_v5  ;;  %v946_v15 = vpack.c.bf16 %v567_v6, %v567_v6  ;;  %v586_v16 = vmax.f32 %v552_v7, 0.0  ;;  %v568_v17 = vmax.f32 %v480_v8, 0.0 }
 0x112   : > { %730 = vst.msk [vmem:[%s1370_s7 + $0x38] sm:$0xf] %vm715_vm3, %v948_v10  ;;  %v962_v18 = vpack.c.bf16 %v583_v11, %v583_v11  ;;  %v949_v19 = vpack.c.bf16 %v570_v12, %v570_v12  ;;  %v584_v20 = vmax.f32 %v544_v13, 0.0 }
 0x113   : > { %746 = vst.msk [vmem:[%s1370_s7 + $0x78] sm:$0xf] %vm715_vm3, %v964_v14  ;;  %728 = vst.msk [vmem:[%s1370_s7 + $0x30] sm:$0xf] %vm715_vm3, %v946_v15  ;;  %v965_v22 = vpack.c.bf16 %v586_v16, %v586_v16  ;;  %v947_v21 = vpack.c.bf16 %v568_v17, %v568_v17 }
 0x114   : > { %744 = vst.msk [vmem:[%s1370_s7 + $0x70] sm:$0xf] %vm715_vm3, %v962_v18  ;;  %731 = vst.msk [vmem:[%s1370_s7 + $0x3c] sm:$0xf] %vm715_vm3, %v949_v19  ;;  %v963_v23 = vpack.c.bf16 %v584_v20, %v584_v20 }
 0x115   : > { %747 = vst.msk [vmem:[%s1370_s7 + $0x7c] sm:$0xf] %vm715_vm3, %v965_v22  ;;  %729 = vst.msk [vmem:[%s1370_s7 + $0x34] sm:$0xf] %vm715_vm3, %v947_v21 }
 0x116   : > { %745 = vst.msk [vmem:[%s1370_s7 + $0x74] sm:$0xf] %vm715_vm3, %v963_v23 }
 0x117   : > { %1130 = shalt.err (!%p1127_p7)
}
 0x118   : > { %s1131_s29 = scalar_lea.hbm %s1459_s21, 2048  ;;  %s1135_s8 = scalar_lea.hbm %s1530_s3, 16384 }
 0x119   : > { %p1132_p9 = scmp.ne.s32.totalorder %s1459_s21, %s1131_s29  ;;  %p1136_p12 = scmp.lt.u32.totalorder %s1459_s21, %s1530_s3 }
 0x11a   : > { %p1137_p13 = scmp.lt.u32.totalorder %s1135_s8, %s1131_s29  ;;  %p1139_p1 = scmp.lt.u32.totalorder %s1131_s29, %s1459_s21 }
 0x11b   : > { %p1133_p10 = pnand %p1132_p9, %p1288_p3 }
 0x11c   : > { %p1138_p0 = por %p1137_p13, %p1136_p12 }
 0x11d   : > { %p1134_p11 = pneg %p1133_p10 }
 0x11e   : > { %p1140_p2 = por %p1139_p1, %p1138_p0 }
 0x120   : > { %p1141_p4 = pnand %p1140_p2, %p1134_p11 }
 0x122   : > { %1144 = shalt.err (!%p1141_p4)
}
 0x123   : > { %s1215_s16 = smov 64   ;;  %s1216_s11 = smov 4  }
 0x124   : > { %1025 = dma.vmem_to_hbm [thread:$0]  (%p1288_p3), %s1461_s10, 2048, %s1459_s21, %s1475_s24, %s1215_s16, %s1215_s16, %s1216_s11  }
 0x125 PF: > { %p1031_p5 = scmp.ge.s32.totalorder %s1211_s19, 2  ;;  %s780_s20 = sand.u32 1, %s1183_s12  }
 0x126   : > { %s781_s27 = scalar_lea.sflag [#allocation3], %s780_s20 }
 0x127   : > { %p1028_p6 = pnand %p1031_p5, %p1297_p8 }
 0x129   : > { %1178 = dma.done.wait (!%p1028_p6), %s781_s27, 2048  }
 0x12a   : > { %1180 = vsyncadd (!%p1028_p6), %s781_s27, 4294965248  ;;  %s16_s19 = sadd.s32 1, %s1211_s19   ;;  %s1533_s12 = smov %s1187_s13 }
 0x12b   : > { %p13_p7 = scmp.ge.s32.totalorder %s16_s19, 10   ;;  %s1534_s13 = smov %s1191_s14 }
 0x12c   : > { %s1535_s14 = smov %s1306_s30  ;;  %s1536_s15 = smov %s1203_s17 }
 0x12d   : > { %s1537_s16 = smov %s1207_s18  ;;  %s1538_s17 = smov %s1541_s22 }
 0x12e   : > { %s1539_s18 = smov %s1545_s23  ;;  %15 = sbr.rel (!%p13_p7) target bundleno = 5 (0x5), region = 67 }
 0x135   :  { %786 = vsyncpa [#allocation3], 1 }
 0x136   :  { %788 = vsyncpa [#allocation3 + $0x1], 1 }

</bundles_post_ra>
